<compile_context>
chip_gen: v7x
topology: tpu7x:2x2x1
jax: 0.10.0
libtpu: 0.0.40
codegen_flags: <defaults>
</compile_context>

<pallas_src>
import functools

import jax
import jax.numpy as jnp
from jax.experimental import pallas as pl
from jax.experimental.pallas import tpu as pltpu

V = 3        # vocab size
E = 8        # embedding dim
H = 16       # LSTM hidden dim
O = 3        # output classes
G = 4 * H    # packed gate width, PyTorch order [i, f, g, o]

# Row offsets inside the packed weight slab.  Each section starts on an
# 8-row boundary so static slices never straddle a (8,128) sublane tile.
_ROW_W_IN = 0    # rows  0..7  : embed @ W_ih^T + (b_ih+b_hh), g-cols pre-scaled by 2
_ROW_W_HH = 8    # rows  8..23 : W_hh^T, g-cols pre-scaled by 2
_ROW_W_FC = 24   # rows 24..39 : fc.weight^T
_ROW_B_FC = 40   # row  40     : fc.bias
_PACK_ROWS = 48
_PACK_LANES = 128


def _lstm_kernel(tok_ref, w_ref, out_ref, *, T, B):
    """Runs the whole sequence for the whole (padded) batch in one invocation.

    tok_ref : (T*B, 1)  int32  tokens, time-major flattened
    w_ref   : (48, 128) f32    packed weight slab (see _ROW_* offsets)
    out_ref : (B, O)    f32    logits
    """
    tok = tok_ref[...]                                   # (T*B, 1) int32
    w_all = w_ref[...]                                   # (48, 128), loaded once

    w_in = w_all[_ROW_W_IN:_ROW_W_IN + V, 0:G]           # (V, 4H)
    w_hh = w_all[_ROW_W_HH:_ROW_W_HH + H, 0:G]           # (H, 4H)
    w_fc = w_all[_ROW_W_FC:_ROW_W_FC + H, 0:O]           # (H, O)
    b_fc = w_all[_ROW_B_FC:_ROW_B_FC + 1, 0:O]           # (1, O)

    # Hoisted input projection for ALL timesteps: V == 3 -> two packed VPU
    # selects, no one-hot, no MXU.  Bias already folded into w_in.
    x_gates = jnp.where(tok == 0, w_in[0:1],
                        jnp.where(tok == 1, w_in[1:2], w_in[2:3]))  # (T*B, 4H)

    h = jnp.zeros((B, H), jnp.float32)
    c = jnp.zeros((B, H), jnp.float32)

    # T is static -> fully unrolled; one serial MXU matmul per step remains
    # on the recurrence critical path.
    # TODO(synk): for T >> 64 switch to lax.fori_loop(..., unroll=k) reading
    # per-step slices from a VMEM scratch to bound vreg pressure.
    # TODO(synk): latch w_hh in the MXU weight registers across the unrolled
    # loop (pltpu.matmul_push_rhs / matmul_acc_lhs / matmul_pop) once the
    # (B,16)x(16,64) tile path is validated per-generation; kept as jnp.dot
    # here to guarantee clean lowering on v5e/v6e/v7x.
    for t in range(T):
        gates = x_gates[t * B:(t + 1) * B] + jnp.dot(
            h, w_hh, preferred_element_type=jnp.float32)            # (B, 4H)
        # Single EUP dispatch per step over the packed gate vreg.  The g-gate
        # columns were pre-scaled by 2 offline, so
        #   tanh(z_g) == 2*sigmoid(2*z_g) - 1 == 2*sig[:, 2H:3H] - 1.
        sig = jax.nn.sigmoid(gates)
        i_g = sig[:, 0 * H:1 * H]
        f_g = sig[:, 1 * H:2 * H]
        g_g = 2.0 * sig[:, 2 * H:3 * H] - 1.0
        o_g = sig[:, 3 * H:4 * H]
        c = f_g * c + i_g * g_g
        h = o_g * jnp.tanh(c)

    # fc on the final hidden state: (B, H) @ (H, O) + (1, O)
    out_ref[...] = jnp.dot(h, w_fc, preferred_element_type=jnp.float32) + b_fc


def lstm_model_forward(tokens, params):
    """tokens: (B, T) int32 in [0, V).  Returns (B, O) f32 logits."""
    B, T = tokens.shape
    # Pad batch to a full sublane group (>= 8); padded rows are free on the
    # MXU/VPU and keep the per-step slices tile-aligned.
    B_pad = max(8, -(-B // 8) * 8)
    tok_p = jnp.zeros((B_pad, T), jnp.int32).at[:B, :].set(tokens.astype(jnp.int32))
    tok_tm = tok_p.T.reshape(T * B_pad, 1)               # time-major token ids

    vmem = pl.BlockSpec(memory_space=pltpu.MemorySpace.VMEM)
    out = pl.pallas_call(
        functools.partial(_lstm_kernel, T=T, B=B_pad),
        out_shape=jax.ShapeDtypeStruct((B_pad, O), jnp.float32),
        in_specs=[vmem, vmem],          # just 2 inputs: tokens + packed weights
        out_specs=vmem,
    )(tok_tm, params["w_pack"])
    return out[:B]


def make_params(key):
    """Deterministic synthetic parameters matching the PyTorch module shapes."""
    ks = jax.random.split(key, 7)
    embed = jax.random.normal(ks[0], (V, E), jnp.float32) * 0.5
    w_ih = jax.random.normal(ks[1], (G, E), jnp.float32) * 0.25    # torch weight_ih_l0
    w_hh = jax.random.normal(ks[2], (G, H), jnp.float32) * 0.25    # torch weight_hh_l0
    b_ih = jax.random.normal(ks[3], (G,), jnp.float32) * 0.1
    b_hh = jax.random.normal(ks[4], (G,), jnp.float32) * 0.1
    w_fc = jax.random.normal(ks[5], (O, H), jnp.float32) * 0.25    # torch fc.weight
    b_fc = jax.random.normal(ks[6], (O,), jnp.float32) * 0.1

    b = (b_ih + b_hh).reshape(1, G)
    w_ih_t = w_ih.T                        # (E, 4H)
    w_hh_t = w_hh.T                        # (H, 4H)
    w_fc_t = w_fc.T                        # (H, O)

    # Fuse embedding + input weights + biases once (exact for integer tokens),
    # then pre-scale the g-gate columns (2H:3H) of both the fused input
    # projection and the recurrent weights by 2 so the kernel can recover
    # tanh(z_g) = 2*sigmoid(2*z_g) - 1 from a single packed sigmoid.
    g_scale = jnp.ones((1, G), jnp.float32).at[:, 2 * H:3 * H].set(2.0)
    w_in_g = (embed @ w_ih_t + b) * g_scale        # (V, 4H)
    w_hh_g = w_hh_t * g_scale                      # (H, 4H)

    # Pack every weight into one lane-padded slab -> single weight input/DMA.
    w_pack = jnp.zeros((_PACK_ROWS, _PACK_LANES), jnp.float32)
    w_pack = w_pack.at[_ROW_W_IN:_ROW_W_IN + V, 0:G].set(w_in_g)
    w_pack = w_pack.at[_ROW_W_HH:_ROW_W_HH + H, 0:G].set(w_hh_g)
    w_pack = w_pack.at[_ROW_W_FC:_ROW_W_FC + H, 0:O].set(w_fc_t)
    w_pack = w_pack.at[_ROW_B_FC, 0:O].set(b_fc)

    return {
        # raw (UNSCALED) pieces used by the pure-JAX reference
        "embed": embed, "w_ih_t": w_ih_t, "w_hh_t": w_hh_t, "b": b,
        "w_fc_t": w_fc_t, "b_fc": b_fc.reshape(1, O),
        # kernel input
        "w_pack": w_pack,
    }


def reference_forward(tokens, params):
    """Pure-JAX reference reproducing the PyTorch forward semantics."""
    x = params["embed"][tokens]                 # (B, T, E)
    B = x.shape[0]
    h = jnp.zeros((B, H), jnp.float32)
    c = jnp.zeros((B, H), jnp.float32)
    for t in range(x.shape[1]):
        gates = x[:, t, :] @ params["w_ih_t"] + h @ params["w_hh_t"] + params["b"]
        i_g = jax.nn.sigmoid(gates[:, 0 * H:1 * H])
        f_g = jax.nn.sigmoid(gates[:, 1 * H:2 * H])
        g_g = jnp.tanh(gates[:, 2 * H:3 * H])
        o_g = jax.nn.sigmoid(gates[:, 3 * H:4 * H])
        c = f_g * c + i_g * g_g
        h = o_g * jnp.tanh(c)
    return h @ params["w_fc_t"] + params["b_fc"]


if __name__ == "__main__":
    key = jax.random.PRNGKey(0)
    pkey, xkey = jax.random.split(key)
    params = make_params(pkey)

    B, T = 2, 8
    tokens = jax.random.randint(xkey, (B, T), 0, V, dtype=jnp.int32)

    out = jax.block_until_ready(lstm_model_forward(tokens, params))
    ref = reference_forward(tokens, params)

    assert out.shape == (B, O)
    assert jnp.allclose(out, ref, atol=5e-4, rtol=5e-4), (out, ref)

    print("KERNEL_OK")
</pallas_src>

<mosaic_0001>
module attributes {stable_mosaic.version = 11 : i64} {
  func.func @_lstm_kernel(%arg0: memref<64x1xi32, #tpu.memory_space<vmem>>, %arg1: memref<48x128xf32, #tpu.memory_space<vmem>>, %arg2: memref<8x3xf32, #tpu.memory_space<vmem>>) attributes {dimension_semantics = [], scalar_prefetch = 0 : i64, scratch_operands = 0 : i64, tpu.core_type = #tpu.core_type<tc>} {
    %c0 = arith.constant 0 : index
    %c0_0 = arith.constant 0 : index
    %0 = vector.load %arg0[%c0, %c0_0] : memref<64x1xi32, #tpu.memory_space<vmem>>, vector<64x1xi32>
    %c0_1 = arith.constant 0 : index
    %c0_2 = arith.constant 0 : index
    %1 = vector.load %arg1[%c0_1, %c0_2] : memref<48x128xf32, #tpu.memory_space<vmem>>, vector<48x128xf32>
    %2 = vector.extract_strided_slice %1 {offsets = [0, 0], sizes = [3, 64], strides = [1, 1]} : vector<48x128xf32> to vector<3x64xf32>
    %3 = vector.extract_strided_slice %1 {offsets = [8, 0], sizes = [16, 64], strides = [1, 1]} : vector<48x128xf32> to vector<16x64xf32>
    %4 = vector.extract_strided_slice %1 {offsets = [24, 0], sizes = [16, 3], strides = [1, 1]} : vector<48x128xf32> to vector<16x3xf32>
    %5 = vector.extract_strided_slice %1 {offsets = [40, 0], sizes = [1, 3], strides = [1, 1]} : vector<48x128xf32> to vector<1x3xf32>
    %c0_i32 = arith.constant 0 : i32
    %6 = vector.broadcast %c0_i32 : i32 to vector<64x1xi32>
    %7 = arith.cmpi eq, %0, %6 : vector<64x1xi32>
    %8 = vector.extract_strided_slice %2 {offsets = [0, 0], sizes = [1, 64], strides = [1, 1]} : vector<3x64xf32> to vector<1x64xf32>
    %c1_i32 = arith.constant 1 : i32
    %9 = vector.broadcast %c1_i32 : i32 to vector<64x1xi32>
    %10 = arith.cmpi eq, %0, %9 : vector<64x1xi32>
    %11 = vector.extract_strided_slice %2 {offsets = [1, 0], sizes = [1, 64], strides = [1, 1]} : vector<3x64xf32> to vector<1x64xf32>
    %12 = vector.extract_strided_slice %2 {offsets = [2, 0], sizes = [1, 64], strides = [1, 1]} : vector<3x64xf32> to vector<1x64xf32>
    %13 = vector.shape_cast %10 : vector<64x1xi1> to vector<64x1xi1>
    %14 = vector.broadcast %13 : vector<64x1xi1> to vector<64x64xi1>
    %15 = vector.shape_cast %11 : vector<1x64xf32> to vector<1x64xf32>
    %16 = vector.broadcast %15 : vector<1x64xf32> to vector<64x64xf32>
    %17 = vector.shape_cast %12 : vector<1x64xf32> to vector<1x64xf32>
    %18 = vector.broadcast %17 : vector<1x64xf32> to vector<64x64xf32>
    %19 = arith.select %14, %16, %18 : vector<64x64xi1>, vector<64x64xf32>
    %20 = vector.shape_cast %7 : vector<64x1xi1> to vector<64x1xi1>
    %21 = vector.broadcast %20 : vector<64x1xi1> to vector<64x64xi1>
    %22 = vector.shape_cast %8 : vector<1x64xf32> to vector<1x64xf32>
    %23 = vector.broadcast %22 : vector<1x64xf32> to vector<64x64xf32>
    %24 = arith.select %21, %23, %19 : vector<64x64xi1>, vector<64x64xf32>
    %cst = arith.constant 0.000000e+00 : f32
    %25 = vector.broadcast %cst : f32 to vector<8x16xf32>
    %cst_3 = arith.constant 0.000000e+00 : f32
    %26 = vector.broadcast %cst_3 : f32 to vector<8x16xf32>
    %27 = vector.extract_strided_slice %24 {offsets = [0, 0], sizes = [8, 64], strides = [1, 1]} : vector<64x64xf32> to vector<8x64xf32>
    %cst_4 = arith.constant dense<0.000000e+00> : vector<8x64xf32>
    %28 = tpu.matmul %25, %3, %cst_4 {dimension_numbers = #tpu.dot_dimension_numbers<[1], [0], [0], [1], [0, 0, 1, 1], [], []>} : vector<8x16xf32>, vector<16x64xf32>, vector<8x64xf32> -> vector<8x64xf32>
    %29 = arith.addf %27, %28 : vector<8x64xf32>
    %30 = arith.negf %29 : vector<8x64xf32>
    %31 = math.exp %30 : vector<8x64xf32>
    %cst_5 = arith.constant 1.000000e+00 : f32
    %32 = vector.broadcast %cst_5 : f32 to vector<8x64xf32>
    %33 = arith.addf %32, %31 : vector<8x64xf32>
    %34 = arith.divf %32, %33 : vector<8x64xf32>
    %35 = vector.extract_strided_slice %34 {offsets = [0, 0], sizes = [8, 16], strides = [1, 1]} : vector<8x64xf32> to vector<8x16xf32>
    %36 = vector.extract_strided_slice %34 {offsets = [0, 16], sizes = [8, 16], strides = [1, 1]} : vector<8x64xf32> to vector<8x16xf32>
    %37 = vector.extract_strided_slice %34 {offsets = [0, 32], sizes = [8, 16], strides = [1, 1]} : vector<8x64xf32> to vector<8x16xf32>
    %cst_6 = arith.constant 2.000000e+00 : f32
    %38 = vector.broadcast %cst_6 : f32 to vector<8x16xf32>
    %39 = arith.mulf %38, %37 : vector<8x16xf32>
    %cst_7 = arith.constant 1.000000e+00 : f32
    %40 = vector.broadcast %cst_7 : f32 to vector<8x16xf32>
    %41 = arith.subf %39, %40 : vector<8x16xf32>
    %42 = vector.extract_strided_slice %34 {offsets = [0, 48], sizes = [8, 16], strides = [1, 1]} : vector<8x64xf32> to vector<8x16xf32>
    %43 = arith.mulf %36, %26 : vector<8x16xf32>
    %44 = arith.mulf %35, %41 : vector<8x16xf32>
    %45 = arith.addf %43, %44 : vector<8x16xf32>
    %46 = math.tanh %45 : vector<8x16xf32>
    %47 = arith.mulf %42, %46 : vector<8x16xf32>
    %48 = vector.extract_strided_slice %24 {offsets = [8, 0], sizes = [8, 64], strides = [1, 1]} : vector<64x64xf32> to vector<8x64xf32>
    %cst_8 = arith.constant dense<0.000000e+00> : vector<8x64xf32>
    %49 = tpu.matmul %47, %3, %cst_8 {dimension_numbers = #tpu.dot_dimension_numbers<[1], [0], [0], [1], [0, 0, 1, 1], [], []>} : vector<8x16xf32>, vector<16x64xf32>, vector<8x64xf32> -> vector<8x64xf32>
    %50 = arith.addf %48, %49 : vector<8x64xf32>
    %51 = arith.negf %50 : vector<8x64xf32>
    %52 = math.exp %51 : vector<8x64xf32>
    %cst_9 = arith.constant 1.000000e+00 : f32
    %53 = vector.broadcast %cst_9 : f32 to vector<8x64xf32>
    %54 = arith.addf %53, %52 : vector<8x64xf32>
    %55 = arith.divf %53, %54 : vector<8x64xf32>
    %56 = vector.extract_strided_slice %55 {offsets = [0, 0], sizes = [8, 16], strides = [1, 1]} : vector<8x64xf32> to vector<8x16xf32>
    %57 = vector.extract_strided_slice %55 {offsets = [0, 16], sizes = [8, 16], strides = [1, 1]} : vector<8x64xf32> to vector<8x16xf32>
    %58 = vector.extract_strided_slice %55 {offsets = [0, 32], sizes = [8, 16], strides = [1, 1]} : vector<8x64xf32> to vector<8x16xf32>
    %cst_10 = arith.constant 2.000000e+00 : f32
    %59 = vector.broadcast %cst_10 : f32 to vector<8x16xf32>
    %60 = arith.mulf %59, %58 : vector<8x16xf32>
    %cst_11 = arith.constant 1.000000e+00 : f32
    %61 = vector.broadcast %cst_11 : f32 to vector<8x16xf32>
    %62 = arith.subf %60, %61 : vector<8x16xf32>
    %63 = vector.extract_strided_slice %55 {offsets = [0, 48], sizes = [8, 16], strides = [1, 1]} : vector<8x64xf32> to vector<8x16xf32>
    %64 = arith.mulf %57, %45 : vector<8x16xf32>
    %65 = arith.mulf %56, %62 : vector<8x16xf32>
    %66 = arith.addf %64, %65 : vector<8x16xf32>
    %67 = math.tanh %66 : vector<8x16xf32>
    %68 = arith.mulf %63, %67 : vector<8x16xf32>
    %69 = vector.extract_strided_slice %24 {offsets = [16, 0], sizes = [8, 64], strides = [1, 1]} : vector<64x64xf32> to vector<8x64xf32>
    %cst_12 = arith.constant dense<0.000000e+00> : vector<8x64xf32>
    %70 = tpu.matmul %68, %3, %cst_12 {dimension_numbers = #tpu.dot_dimension_numbers<[1], [0], [0], [1], [0, 0, 1, 1], [], []>} : vector<8x16xf32>, vector<16x64xf32>, vector<8x64xf32> -> vector<8x64xf32>
    %71 = arith.addf %69, %70 : vector<8x64xf32>
    %72 = arith.negf %71 : vector<8x64xf32>
    %73 = math.exp %72 : vector<8x64xf32>
    %cst_13 = arith.constant 1.000000e+00 : f32
    %74 = vector.broadcast %cst_13 : f32 to vector<8x64xf32>
    %75 = arith.addf %74, %73 : vector<8x64xf32>
    %76 = arith.divf %74, %75 : vector<8x64xf32>
    %77 = vector.extract_strided_slice %76 {offsets = [0, 0], sizes = [8, 16], strides = [1, 1]} : vector<8x64xf32> to vector<8x16xf32>
    %78 = vector.extract_strided_slice %76 {offsets = [0, 16], sizes = [8, 16], strides = [1, 1]} : vector<8x64xf32> to vector<8x16xf32>
    %79 = vector.extract_strided_slice %76 {offsets = [0, 32], sizes = [8, 16], strides = [1, 1]} : vector<8x64xf32> to vector<8x16xf32>
    %cst_14 = arith.constant 2.000000e+00 : f32
    %80 = vector.broadcast %cst_14 : f32 to vector<8x16xf32>
    %81 = arith.mulf %80, %79 : vector<8x16xf32>
    %cst_15 = arith.constant 1.000000e+00 : f32
    %82 = vector.broadcast %cst_15 : f32 to vector<8x16xf32>
    %83 = arith.subf %81, %82 : vector<8x16xf32>
    %84 = vector.extract_strided_slice %76 {offsets = [0, 48], sizes = [8, 16], strides = [1, 1]} : vector<8x64xf32> to vector<8x16xf32>
    %85 = arith.mulf %78, %66 : vector<8x16xf32>
    %86 = arith.mulf %77, %83 : vector<8x16xf32>
    %87 = arith.addf %85, %86 : vector<8x16xf32>
    %88 = math.tanh %87 : vector<8x16xf32>
    %89 = arith.mulf %84, %88 : vector<8x16xf32>
    %90 = vector.extract_strided_slice %24 {offsets = [24, 0], sizes = [8, 64], strides = [1, 1]} : vector<64x64xf32> to vector<8x64xf32>
    %cst_16 = arith.constant dense<0.000000e+00> : vector<8x64xf32>
    %91 = tpu.matmul %89, %3, %cst_16 {dimension_numbers = #tpu.dot_dimension_numbers<[1], [0], [0], [1], [0, 0, 1, 1], [], []>} : vector<8x16xf32>, vector<16x64xf32>, vector<8x64xf32> -> vector<8x64xf32>
    %92 = arith.addf %90, %91 : vector<8x64xf32>
    %93 = arith.negf %92 : vector<8x64xf32>
    %94 = math.exp %93 : vector<8x64xf32>
    %cst_17 = arith.constant 1.000000e+00 : f32
    %95 = vector.broadcast %cst_17 : f32 to vector<8x64xf32>
    %96 = arith.addf %95, %94 : vector<8x64xf32>
    %97 = arith.divf %95, %96 : vector<8x64xf32>
    %98 = vector.extract_strided_slice %97 {offsets = [0, 0], sizes = [8, 16], strides = [1, 1]} : vector<8x64xf32> to vector<8x16xf32>
    %99 = vector.extract_strided_slice %97 {offsets = [0, 16], sizes = [8, 16], strides = [1, 1]} : vector<8x64xf32> to vector<8x16xf32>
    %100 = vector.extract_strided_slice %97 {offsets = [0, 32], sizes = [8, 16], strides = [1, 1]} : vector<8x64xf32> to vector<8x16xf32>
    %cst_18 = arith.constant 2.000000e+00 : f32
    %101 = vector.broadcast %cst_18 : f32 to vector<8x16xf32>
    %102 = arith.mulf %101, %100 : vector<8x16xf32>
    %cst_19 = arith.constant 1.000000e+00 : f32
    %103 = vector.broadcast %cst_19 : f32 to vector<8x16xf32>
    %104 = arith.subf %102, %103 : vector<8x16xf32>
    %105 = vector.extract_strided_slice %97 {offsets = [0, 48], sizes = [8, 16], strides = [1, 1]} : vector<8x64xf32> to vector<8x16xf32>
    %106 = arith.mulf %99, %87 : vector<8x16xf32>
    %107 = arith.mulf %98, %104 : vector<8x16xf32>
    %108 = arith.addf %106, %107 : vector<8x16xf32>
    %109 = math.tanh %108 : vector<8x16xf32>
    %110 = arith.mulf %105, %109 : vector<8x16xf32>
    %111 = vector.extract_strided_slice %24 {offsets = [32, 0], sizes = [8, 64], strides = [1, 1]} : vector<64x64xf32> to vector<8x64xf32>
    %cst_20 = arith.constant dense<0.000000e+00> : vector<8x64xf32>
    %112 = tpu.matmul %110, %3, %cst_20 {dimension_numbers = #tpu.dot_dimension_numbers<[1], [0], [0], [1], [0, 0, 1, 1], [], []>} : vector<8x16xf32>, vector<16x64xf32>, vector<8x64xf32> -> vector<8x64xf32>
    %113 = arith.addf %111, %112 : vector<8x64xf32>
    %114 = arith.negf %113 : vector<8x64xf32>
    %115 = math.exp %114 : vector<8x64xf32>
    %cst_21 = arith.constant 1.000000e+00 : f32
    %116 = vector.broadcast %cst_21 : f32 to vector<8x64xf32>
    %117 = arith.addf %116, %115 : vector<8x64xf32>
    %118 = arith.divf %116, %117 : vector<8x64xf32>
    %119 = vector.extract_strided_slice %118 {offsets = [0, 0], sizes = [8, 16], strides = [1, 1]} : vector<8x64xf32> to vector<8x16xf32>
    %120 = vector.extract_strided_slice %118 {offsets = [0, 16], sizes = [8, 16], strides = [1, 1]} : vector<8x64xf32> to vector<8x16xf32>
    %121 = vector.extract_strided_slice %118 {offsets = [0, 32], sizes = [8, 16], strides = [1, 1]} : vector<8x64xf32> to vector<8x16xf32>
    %cst_22 = arith.constant 2.000000e+00 : f32
    %122 = vector.broadcast %cst_22 : f32 to vector<8x16xf32>
    %123 = arith.mulf %122, %121 : vector<8x16xf32>
    %cst_23 = arith.constant 1.000000e+00 : f32
    %124 = vector.broadcast %cst_23 : f32 to vector<8x16xf32>
    %125 = arith.subf %123, %124 : vector<8x16xf32>
    %126 = vector.extract_strided_slice %118 {offsets = [0, 48], sizes = [8, 16], strides = [1, 1]} : vector<8x64xf32> to vector<8x16xf32>
    %127 = arith.mulf %120, %108 : vector<8x16xf32>
    %128 = arith.mulf %119, %125 : vector<8x16xf32>
    %129 = arith.addf %127, %128 : vector<8x16xf32>
    %130 = math.tanh %129 : vector<8x16xf32>
    %131 = arith.mulf %126, %130 : vector<8x16xf32>
    %132 = vector.extract_strided_slice %24 {offsets = [40, 0], sizes = [8, 64], strides = [1, 1]} : vector<64x64xf32> to vector<8x64xf32>
    %cst_24 = arith.constant dense<0.000000e+00> : vector<8x64xf32>
    %133 = tpu.matmul %131, %3, %cst_24 {dimension_numbers = #tpu.dot_dimension_numbers<[1], [0], [0], [1], [0, 0, 1, 1], [], []>} : vector<8x16xf32>, vector<16x64xf32>, vector<8x64xf32> -> vector<8x64xf32>
    %134 = arith.addf %132, %133 : vector<8x64xf32>
    %135 = arith.negf %134 : vector<8x64xf32>
    %136 = math.exp %135 : vector<8x64xf32>
    %cst_25 = arith.constant 1.000000e+00 : f32
    %137 = vector.broadcast %cst_25 : f32 to vector<8x64xf32>
    %138 = arith.addf %137, %136 : vector<8x64xf32>
    %139 = arith.divf %137, %138 : vector<8x64xf32>
    %140 = vector.extract_strided_slice %139 {offsets = [0, 0], sizes = [8, 16], strides = [1, 1]} : vector<8x64xf32> to vector<8x16xf32>
    %141 = vector.extract_strided_slice %139 {offsets = [0, 16], sizes = [8, 16], strides = [1, 1]} : vector<8x64xf32> to vector<8x16xf32>
    %142 = vector.extract_strided_slice %139 {offsets = [0, 32], sizes = [8, 16], strides = [1, 1]} : vector<8x64xf32> to vector<8x16xf32>
    %cst_26 = arith.constant 2.000000e+00 : f32
    %143 = vector.broadcast %cst_26 : f32 to vector<8x16xf32>
    %144 = arith.mulf %143, %142 : vector<8x16xf32>
    %cst_27 = arith.constant 1.000000e+00 : f32
    %145 = vector.broadcast %cst_27 : f32 to vector<8x16xf32>
    %146 = arith.subf %144, %145 : vector<8x16xf32>
    %147 = vector.extract_strided_slice %139 {offsets = [0, 48], sizes = [8, 16], strides = [1, 1]} : vector<8x64xf32> to vector<8x16xf32>
    %148 = arith.mulf %141, %129 : vector<8x16xf32>
    %149 = arith.mulf %140, %146 : vector<8x16xf32>
    %150 = arith.addf %148, %149 : vector<8x16xf32>
    %151 = math.tanh %150 : vector<8x16xf32>
    %152 = arith.mulf %147, %151 : vector<8x16xf32>
    %153 = vector.extract_strided_slice %24 {offsets = [48, 0], sizes = [8, 64], strides = [1, 1]} : vector<64x64xf32> to vector<8x64xf32>
    %cst_28 = arith.constant dense<0.000000e+00> : vector<8x64xf32>
    %154 = tpu.matmul %152, %3, %cst_28 {dimension_numbers = #tpu.dot_dimension_numbers<[1], [0], [0], [1], [0, 0, 1, 1], [], []>} : vector<8x16xf32>, vector<16x64xf32>, vector<8x64xf32> -> vector<8x64xf32>
    %155 = arith.addf %153, %154 : vector<8x64xf32>
    %156 = arith.negf %155 : vector<8x64xf32>
    %157 = math.exp %156 : vector<8x64xf32>
    %cst_29 = arith.constant 1.000000e+00 : f32
    %158 = vector.broadcast %cst_29 : f32 to vector<8x64xf32>
    %159 = arith.addf %158, %157 : vector<8x64xf32>
    %160 = arith.divf %158, %159 : vector<8x64xf32>
    %161 = vector.extract_strided_slice %160 {offsets = [0, 0], sizes = [8, 16], strides = [1, 1]} : vector<8x64xf32> to vector<8x16xf32>
    %162 = vector.extract_strided_slice %160 {offsets = [0, 16], sizes = [8, 16], strides = [1, 1]} : vector<8x64xf32> to vector<8x16xf32>
    %163 = vector.extract_strided_slice %160 {offsets = [0, 32], sizes = [8, 16], strides = [1, 1]} : vector<8x64xf32> to vector<8x16xf32>
    %cst_30 = arith.constant 2.000000e+00 : f32
    %164 = vector.broadcast %cst_30 : f32 to vector<8x16xf32>
    %165 = arith.mulf %164, %163 : vector<8x16xf32>
    %cst_31 = arith.constant 1.000000e+00 : f32
    %166 = vector.broadcast %cst_31 : f32 to vector<8x16xf32>
    %167 = arith.subf %165, %166 : vector<8x16xf32>
    %168 = vector.extract_strided_slice %160 {offsets = [0, 48], sizes = [8, 16], strides = [1, 1]} : vector<8x64xf32> to vector<8x16xf32>
    %169 = arith.mulf %162, %150 : vector<8x16xf32>
    %170 = arith.mulf %161, %167 : vector<8x16xf32>
    %171 = arith.addf %169, %170 : vector<8x16xf32>
    %172 = math.tanh %171 : vector<8x16xf32>
    %173 = arith.mulf %168, %172 : vector<8x16xf32>
    %174 = vector.extract_strided_slice %24 {offsets = [56, 0], sizes = [8, 64], strides = [1, 1]} : vector<64x64xf32> to vector<8x64xf32>
    %cst_32 = arith.constant dense<0.000000e+00> : vector<8x64xf32>
    %175 = tpu.matmul %173, %3, %cst_32 {dimension_numbers = #tpu.dot_dimension_numbers<[1], [0], [0], [1], [0, 0, 1, 1], [], []>} : vector<8x16xf32>, vector<16x64xf32>, vector<8x64xf32> -> vector<8x64xf32>
    %176 = arith.addf %174, %175 : vector<8x64xf32>
    %177 = arith.negf %176 : vector<8x64xf32>
    %178 = math.exp %177 : vector<8x64xf32>
    %cst_33 = arith.constant 1.000000e+00 : f32
    %179 = vector.broadcast %cst_33 : f32 to vector<8x64xf32>
    %180 = arith.addf %179, %178 : vector<8x64xf32>
    %181 = arith.divf %179, %180 : vector<8x64xf32>
    %182 = vector.extract_strided_slice %181 {offsets = [0, 0], sizes = [8, 16], strides = [1, 1]} : vector<8x64xf32> to vector<8x16xf32>
    %183 = vector.extract_strided_slice %181 {offsets = [0, 16], sizes = [8, 16], strides = [1, 1]} : vector<8x64xf32> to vector<8x16xf32>
    %184 = vector.extract_strided_slice %181 {offsets = [0, 32], sizes = [8, 16], strides = [1, 1]} : vector<8x64xf32> to vector<8x16xf32>
    %cst_34 = arith.constant 2.000000e+00 : f32
    %185 = vector.broadcast %cst_34 : f32 to vector<8x16xf32>
    %186 = arith.mulf %185, %184 : vector<8x16xf32>
    %cst_35 = arith.constant 1.000000e+00 : f32
    %187 = vector.broadcast %cst_35 : f32 to vector<8x16xf32>
    %188 = arith.subf %186, %187 : vector<8x16xf32>
    %189 = vector.extract_strided_slice %181 {offsets = [0, 48], sizes = [8, 16], strides = [1, 1]} : vector<8x64xf32> to vector<8x16xf32>
    %190 = arith.mulf %183, %171 : vector<8x16xf32>
    %191 = arith.mulf %182, %188 : vector<8x16xf32>
    %192 = arith.addf %190, %191 : vector<8x16xf32>
    %193 = math.tanh %192 : vector<8x16xf32>
    %194 = arith.mulf %189, %193 : vector<8x16xf32>
    %cst_36 = arith.constant dense<0.000000e+00> : vector<8x3xf32>
    %195 = tpu.matmul %194, %4, %cst_36 {dimension_numbers = #tpu.dot_dimension_numbers<[1], [0], [0], [1], [0, 0, 1, 1], [], []>} : vector<8x16xf32>, vector<16x3xf32>, vector<8x3xf32> -> vector<8x3xf32>
    %196 = vector.broadcast %5 : vector<1x3xf32> to vector<8x3xf32>
    %197 = arith.addf %195, %196 : vector<8x3xf32>
    %c0_37 = arith.constant 0 : index
    %c0_38 = arith.constant 0 : index
    %198 = vector.load %arg2[%c0_37, %c0_38] : memref<8x3xf32, #tpu.memory_space<vmem>>, vector<8x3xf32>
    tpu.vector_store %arg2[%c0_37, %c0_38], %197 {strides = array<i32>} : memref<8x3xf32, #tpu.memory_space<vmem>>, vector<8x3xf32>,
    return
  }
}

</mosaic_0001>

<bundles_post_ra>
// kernel: tpu_custom_call.1
= control target key start
LH: loop header
LB: loop body
LE: loop exit
PB: predicated region body
PF: predicated region fallthrough
CT: control target
= control target key end

     0   :  { %v1240_v0 = vmov 0.0|0.0   ;;  %vm1241_vm0 = vmmov 0   ;;  %v1242_v3 = vmov 0.0   ;;  %v1243_v6 = vmov 0   ;;  %s1244_s17 = smov 96   ;;  %s1245_s18 = smov 16   ;;  %s1443_s1 = inlined_call_operand.vmem [shape: f32[48,128], index: 1, kind: input, shape index: {}]   ;;  %s1444_s0 = inlined_call_operand.vmem [shape: s32[64,1], index: 0, kind: input, shape index: {}]   ;;  %s1445_s2 = inlined_call_operand.vmem [shape: f32[8,3], index: 2, kind: output, shape index: {}]  }
   0x1   :  { %1155 = vmatprep.subr.bf16.mxu0 %v1240_v0  ;;  %v20_v1 = vld [vmem:[%s1443_s1 + $0x8] sm:$0xff]  ;;  %v21_v2 = vld [vmem:[%s1443_s1 + $0x10] sm:$0xff]  ;;  %1096 = vmatprep.mubr.msk.f32.mxu0 %vm1241_vm0, %v1242_v3  ;;  %v11_v4 = vld [vmem:[%s1444_s0] sm:$0xff]  ;;  %v81_v9 = vlaneseq  ;;  %s1246_s21 = smov 32   ;;  %s1247_s22 = smov 80   ;;  %vm149_vm7 = vcmask 130048  }
   0x2   :  { %v1275_v5 = vpack.c.bf16 %v21_v2, %v20_v1  ;;  %1190 = vset.pattern.permute.xlu0 %v1243_v6  ;;  %vm33_vm1 = vcmp.eq.s32.totalorder %v11_v4, 1  ;;  %vm25_vm2 = vcmp.eq.s32.totalorder %v11_v4, 0  ;;  %1191 = vset.pattern.permute.xlu1 %v1243_v6  ;;  %v19_v14 = vld [vmem:[%s1443_s1] sm:$0xff]  ;;  %v12_v36 = vld [vmem:[%s1444_s0 + $0x8] sm:$0xff]  ;;  %v13_v61 = vld [vmem:[%s1444_s0 + $0x10] sm:$0xff] }
   0x3   :  { %v41_v7 = vsel %vm33_vm1, 1, %v1243_v6  ;;  %1158 = vmatprep.subr.bf16.mxu1 %v1240_v0  ;;  %1103 = vmatprep.mubr.msk.f32.mxu1 %vm1241_vm0, %v1242_v3  ;;  %v97_v8 = vsel %vm25_vm2, 1, %v1243_v6  ;;  %v1293_v10 = vshrl.u32 %v81_v9, 7  ;;  %vm34_vm5 = vcmp.eq.s32.totalorder %v12_v36, 1 }
   0x4   :  { %1157 = vmatpush3.bf16.msra.mxu0 %v1275_v5  ;;  %50 = vperm.xlu0 %1190, %v41_v7   ;;  %v42_v38 = vsel %vm34_vm5, 1, %v1243_v6  ;;  %vm26_vm6 = vcmp.eq.s32.totalorder %v12_v36, 0  ;;  %vm35_vm10 = vcmp.eq.s32.totalorder %v13_v61, 1  ;;  %vm27_vm11 = vcmp.eq.s32.totalorder %v13_v61, 0 }
   0x5   :  { %1160 = vmatpush3.bf16.msra.mxu1 %v1275_v5  ;;  %1161 = vmatprep.subr.bf16.mxu0 %v1240_v0  ;;  %v83_v12 = vsub.s32 1, %v1293_v10  ;;  %v87_v13 = vsub.s32 2, %v1293_v10  ;;  %v139_v15 = vsub.s32 0, %v1293_v10  ;;  %v98_v41 = vsel %vm26_vm6, 1, %v1243_v6 }
   0x6   :  { %1164 = vmatprep.subr.bf16.mxu1 %v1240_v0  ;;  %v43_v63 = vsel %vm35_vm10, 1, %v1243_v6  ;;  %v99_v4 = vsel %vm27_vm11, 1, %v1243_v6 }
   0x7   :  { %1097 = vmatmul.mubr.f32.vlgmr.msra.gmra.mrb[0].mxu0 %v1242_v3  ;;  %v1301_v16 = vrot.slane %v19_v14, %v83_v12  ;;  %v1303_v17 = vrot.slane %v19_v14, %v87_v13  ;;  %v1307_v19 = vrot.slane %v19_v14, %v139_v15 }
   0x8   :  { %106 = vperm.xlu0 %1190, %v97_v8   ;;  %1163 = vmatpush3.bf16.msra.mxu0 %v1275_v5 }
   0x9   :  { %1110 = vmatprep.mubr.msk.f32.mxu0 %vm1241_vm0, %v1242_v3  ;;  %1167 = vmatprep.subr.bf16.mxu0 %v1240_v0 }
  0x83   :  { %v51_v11 = vpop.permute.xlu0 %50 }
  0x84   :  { %vm73_vm3 = vcmp.eq.s32.totalorder %v51_v11, 1 }
  0x85   :  { %v89_v20 = vsel %vm73_vm3, %v1301_v16, %v1303_v17 }
  0x87   :  { %v107_v18 = vpop.permute.xlu0 %106 }
  0x88   :  { %vm129_vm4 = vcmp.eq.s32.totalorder %v107_v18, 1 }
  0x89   :  { %v141_v21 = vsel %vm129_vm4, %v1307_v19, %v89_v20 }
  0xda   :  { %v219_v22 = vpop.f32.mrb[0].mxu0 }
  0xdb   :  { %v223_v23 = vadd.f32 %v219_v22, %v141_v21  ;;  %v1098_v24 = vpop.f32.mrb[1].mxu0 }
  0xdd   :  { %v1041_v25 = vmul.f32 -1.442695, %v223_v23 }
  0xdf   :  { %1192 = vpow2.f32 %v1041_v25 }
  0xe9   :  { %v1193_v26 = vpop.eup %1192 }
  0xea   :  { %v227_v27 = vadd.f32 1.0, %v1193_v26 }
  0xec   :  { %1194 = vrcp.f32 %v227_v27 }
  0xf6   :  { %v1195_v28 = vpop.eup %1194 }
  0xf7   :  { %v230_v29 = vmul.f32 2.0, %v1195_v28  ;;  %v232_v33 = vmul.f32 0.0, %v1195_v28 }
  0xf9   :  { %v1042_v30 = vadd.f32 -1.0, %v230_v29 }
  0xfb   :  { %234 = vrot.lane.b32.xlu1 %v1042_v30, %s1244_s17 }
 0x16d   :  { %v235_v31 = vpop.permute.xlu1 %234 }
 0x16e   :  { %v237_v32 = vmul.f32 %v1195_v28, %v235_v31  ;;  %v14_v31 = vld [vmem:[%s1444_s0 + $0x18] sm:$0xff] }
 0x16f   :  { %vm36_vm14 = vcmp.eq.s32.totalorder %v14_v31, 1  ;;  %vm28_vm15 = vcmp.eq.s32.totalorder %v14_v31, 0 }
 0x170   :  { %239 = vrot.lane.b32.xlu1 %v237_v32, %s1245_s18  ;;  %v100_v36 = vsel %vm28_vm15, 1, %v1243_v6 }
 0x1e2   :  { %v240_v34 = vpop.permute.xlu1 %239 }
 0x1e3   :  { %v242_v35 = vadd.f32 %v240_v34, %v232_v33  ;;  %v44_v33 = vsel %vm36_vm14, 1, %v1243_v6 }
 0x1e5   :  { %1196 = vtanh.f32 %v242_v35 }
 0x1ef   :  { %v1197_v37 = vpop.eup %1196 }
 0x1f0   :  { %245 = vrot.lane.b32.xlu0 %v1197_v37, %s1246_s21 }
 0x1f4   :  { %53 = vperm.xlu0 %1190, %v42_v38  }
 0x262   :  { %v246_v39 = vpop.permute.xlu0 %245 }
 0x263   :  { %v248_v40 = vmul.f32 %v1195_v28, %v246_v39 }
 0x265   :  { %250 = vrot.lane.b32.xlu1 %v248_v40, %s1247_s22 }
 0x269   :  { %109 = vperm.xlu1 %1191, %v98_v41  }
 0x273   :  { %v54_v43 = vpop.permute.xlu0 %53 }
 0x274   :  { %vm74_vm8 = vcmp.eq.s32.totalorder %v54_v43, 1 }
 0x275   :  { %v90_v45 = vsel %vm74_vm8, %v1301_v16, %v1303_v17 }
 0x2d7   :  { %v251_v42 = vpop.permute.xlu1 %250 }
 0x2d8   :  { %1104 = vmatmul.mubr.msk.f32.vlgmr.msra.gmra.mrb[0].mxu1 %vm149_vm7, %v251_v42 }
 0x2d9   :  { %1166 = vmatpush3.bf16.msra.mxu1 %v1275_v5  ;;  %1117 = vmatprep.mubr.msk.f32.mxu1 %vm1241_vm0, %v1242_v3 }
 0x2da   :  { %1170 = vmatprep.subr.bf16.mxu1 %v1240_v0 }
 0x2e8   :  { %v110_v44 = vpop.permute.xlu1 %109 }
 0x2e9   :  { %vm130_vm9 = vcmp.eq.s32.totalorder %v110_v44, 1 }
 0x2ea   :  { %v142_v46 = vsel %vm130_vm9, %v1307_v19, %v90_v45 }
 0x3ab   :  { %v320_v47 = vpop.f32.mrb[0].mxu1 }
 0x3ac   :  { %v324_v48 = vadd.f32 %v320_v47, %v142_v46  ;;  %v1105_v49 = vpop.f32.mrb[1].mxu1 }
 0x3ae   :  { %v1044_v50 = vmul.f32 -1.442695, %v324_v48 }
 0x3b0   :  { %1198 = vpow2.f32 %v1044_v50 }
 0x3ba   :  { %v1199_v51 = vpop.eup %1198 }
 0x3bb   :  { %v328_v52 = vadd.f32 1.0, %v1199_v51 }
 0x3bd   :  { %1200 = vrcp.f32 %v328_v52 }
 0x3c7   :  { %v1201_v53 = vpop.eup %1200 }
 0x3c8   :  { %v331_v54 = vmul.f32 2.0, %v1201_v53  ;;  %v333_v58 = vmul.f32 %v1201_v53, %v242_v35 }
 0x3ca   :  { %v1045_v55 = vadd.f32 -1.0, %v331_v54 }
 0x3cc   :  { %335 = vrot.lane.b32.xlu0 %v1045_v55, %s1244_s17 }
 0x43e   :  { %v336_v56 = vpop.permute.xlu0 %335 }
 0x43f   :  { %v338_v57 = vmul.f32 %v1201_v53, %v336_v56  ;;  %v15_v56 = vld [vmem:[%s1444_s0 + $0x20] sm:$0xff] }
 0x440   :  { %vm37_vm3 = vcmp.eq.s32.totalorder %v15_v56, 1  ;;  %vm29_vm4 = vcmp.eq.s32.totalorder %v15_v56, 0 }
 0x441   :  { %340 = vrot.lane.b32.xlu1 %v338_v57, %s1245_s18  ;;  %v101_v61 = vsel %vm29_vm4, 1, %v1243_v6  ;;  %vm1035_vm4 = vcmask 23552  }
 0x4b3   :  { %v341_v59 = vpop.permute.xlu1 %340 }
 0x4b4   :  { %v343_v60 = vadd.f32 %v341_v59, %v333_v58  ;;  %v45_v58 = vsel %vm37_vm3, 1, %v1243_v6 }
 0x4b6   :  { %1202 = vtanh.f32 %v343_v60 }
 0x4c0   :  { %v1203_v62 = vpop.eup %1202 }
 0x4c1   :  { %346 = vrot.lane.b32.xlu0 %v1203_v62, %s1246_s21 }
 0x4c5   :  { %56 = vperm.xlu0 %1190, %v43_v63  }
 0x533   :  { %v347_v1 = vpop.permute.xlu0 %346 }
 0x534   :  { %v349_v2 = vmul.f32 %v1201_v53, %v347_v1 }
 0x536   :  { %351 = vrot.lane.b32.xlu1 %v349_v2, %s1247_s22 }
 0x53a   :  { %112 = vperm.xlu1 %1191, %v99_v4  }
 0x544   :  { %v57_v8 = vpop.permute.xlu0 %56 }
 0x545   :  { %vm75_vm12 = vcmp.eq.s32.totalorder %v57_v8, 1 }
 0x546   :  { %v91_v11 = vsel %vm75_vm12, %v1301_v16, %v1303_v17 }
 0x5a8   :  { %v352_v7 = vpop.permute.xlu1 %351 }
 0x5a9   :  { %1111 = vmatmul.mubr.msk.f32.vlgmr.msra.gmra.mrb[2].mxu0 %vm149_vm7, %v352_v7 }
 0x5aa   :  { %1169 = vmatpush3.bf16.msra.mxu0 %v1275_v5  ;;  %1124 = vmatprep.mubr.msk.f32.mxu0 %vm1241_vm0, %v1242_v3 }
 0x5ab   :  { %1173 = vmatprep.subr.bf16.mxu0 %v1240_v0 }
 0x5b9   :  { %v113_v9 = vpop.permute.xlu1 %112 }
 0x5ba   :  { %vm131_vm13 = vcmp.eq.s32.totalorder %v113_v9, 1 }
 0x5bb   :  { %v143_v12 = vsel %vm131_vm13, %v1307_v19, %v91_v11 }
 0x67c   :  { %v421_v13 = vpop.f32.mrb[2].mxu0 }
 0x67d   :  { %v425_v14 = vadd.f32 %v421_v13, %v143_v12  ;;  %v1112_v18 = vpop.f32.mrb[3].mxu0 }
 0x67f   :  { %v1047_v20 = vmul.f32 -1.442695, %v425_v14 }
 0x681   :  { %1204 = vpow2.f32 %v1047_v20 }
 0x68b   :  { %v1205_v21 = vpop.eup %1204 }
 0x68c   :  { %v429_v22 = vadd.f32 1.0, %v1205_v21 }
 0x68e   :  { %1206 = vrcp.f32 %v429_v22 }
 0x698   :  { %v1207_v23 = vpop.eup %1206 }
 0x699   :  { %v432_v24 = vmul.f32 2.0, %v1207_v23  ;;  %v434_v28 = vmul.f32 %v1207_v23, %v343_v60 }
 0x69b   :  { %v1048_v25 = vadd.f32 -1.0, %v432_v24 }
 0x69d   :  { %436 = vrot.lane.b32.xlu0 %v1048_v25, %s1244_s17  ;;  %v16_v25 = vld [vmem:[%s1444_s0 + $0x28] sm:$0xff] }
 0x69e   :  { %vm38_vm8 = vcmp.eq.s32.totalorder %v16_v25, 1  ;;  %vm30_vm9 = vcmp.eq.s32.totalorder %v16_v25, 0 }
 0x70f   :  { %v437_v26 = vpop.permute.xlu0 %436 }
 0x710   :  { %v439_v27 = vmul.f32 %v1207_v23, %v437_v26 }
 0x712   :  { %441 = vrot.lane.b32.xlu1 %v439_v27, %s1245_s18  ;;  %v46_v27 = vsel %vm38_vm8, 1, %v1243_v6 }
 0x784   :  { %v442_v29 = vpop.permute.xlu1 %441 }
 0x785   :  { %v444_v30 = vadd.f32 %v442_v29, %v434_v28 }
 0x787   :  { %1208 = vtanh.f32 %v444_v30 }
 0x791   :  { %v1209_v32 = vpop.eup %1208 }
 0x792   :  { %447 = vrot.lane.b32.xlu0 %v1209_v32, %s1246_s21 }
 0x796   :  { %59 = vperm.xlu0 %1190, %v44_v33  }
 0x804   :  { %v448_v34 = vpop.permute.xlu0 %447 }
 0x805   :  { %v450_v35 = vmul.f32 %v1207_v23, %v448_v34 }
 0x807   :  { %452 = vrot.lane.b32.xlu1 %v450_v35, %s1247_s22 }
 0x80b   :  { %115 = vperm.xlu1 %1191, %v100_v36  }
 0x815   :  { %v60_v38 = vpop.permute.xlu0 %59 }
 0x816   :  { %vm76_vm1 = vcmp.eq.s32.totalorder %v60_v38, 1 }
 0x817   :  { %v92_v40 = vsel %vm76_vm1, %v1301_v16, %v1303_v17 }
 0x879   :  { %v453_v37 = vpop.permute.xlu1 %452 }
 0x87a   :  { %1118 = vmatmul.mubr.msk.f32.vlgmr.msra.gmra.mrb[2].mxu1 %vm149_vm7, %v453_v37 }
 0x87b   :  { %1172 = vmatpush3.bf16.msra.mxu1 %v1275_v5  ;;  %1131 = vmatprep.mubr.msk.f32.mxu1 %vm1241_vm0, %v1242_v3 }
 0x87c   :  { %1176 = vmatprep.subr.bf16.mxu1 %v1240_v0 }
 0x88a   :  { %v116_v39 = vpop.permute.xlu1 %115 }
 0x88b   :  { %vm132_vm2 = vcmp.eq.s32.totalorder %v116_v39, 1 }
 0x88c   :  { %v144_v41 = vsel %vm132_vm2, %v1307_v19, %v92_v40 }
 0x94d   :  { %v522_v42 = vpop.f32.mrb[2].mxu1 }
 0x94e   :  { %v526_v43 = vadd.f32 %v522_v42, %v144_v41  ;;  %v1119_v44 = vpop.f32.mrb[3].mxu1 }
 0x950   :  { %v1050_v45 = vmul.f32 -1.442695, %v526_v43 }
 0x952   :  { %1210 = vpow2.f32 %v1050_v45 }
 0x95c   :  { %v1211_v46 = vpop.eup %1210 }
 0x95d   :  { %v530_v47 = vadd.f32 1.0, %v1211_v46 }
 0x95f   :  { %1212 = vrcp.f32 %v530_v47 }
 0x969   :  { %v1213_v48 = vpop.eup %1212 }
 0x96a   :  { %v533_v49 = vmul.f32 2.0, %v1213_v48  ;;  %v535_v53 = vmul.f32 %v1213_v48, %v444_v30  ;;  %v102_v30 = vsel %vm30_vm9, 1, %v1243_v6 }
 0x96c   :  { %v1051_v50 = vadd.f32 -1.0, %v533_v49  ;;  %v17_v49 = vld [vmem:[%s1444_s0 + $0x30] sm:$0xff] }
 0x96d   :  { %vm39_vm12 = vcmp.eq.s32.totalorder %v17_v49, 1  ;;  %vm31_vm13 = vcmp.eq.s32.totalorder %v17_v49, 0 }
 0x96e   :  { %537 = vrot.lane.b32.xlu0 %v1051_v50, %s1244_s17 }
 0x9e0   :  { %v538_v51 = vpop.permute.xlu0 %537 }
 0x9e1   :  { %v540_v52 = vmul.f32 %v1213_v48, %v538_v51  ;;  %v47_v51 = vsel %vm39_vm12, 1, %v1243_v6 }
 0x9e3   :  { %542 = vrot.lane.b32.xlu1 %v540_v52, %s1245_s18 }
 0xa55   :  { %v543_v54 = vpop.permute.xlu1 %542 }
 0xa56   :  { %v545_v55 = vadd.f32 %v543_v54, %v535_v53  ;;  %v103_v54 = vsel %vm31_vm13, 1, %v1243_v6 }
 0xa58   :  { %1214 = vtanh.f32 %v545_v55 }
 0xa62   :  { %v1215_v57 = vpop.eup %1214 }
 0xa63   :  { %548 = vrot.lane.b32.xlu0 %v1215_v57, %s1246_s21 }
 0xa67   :  { %62 = vperm.xlu0 %1190, %v45_v58  }
 0xad5   :  { %v549_v59 = vpop.permute.xlu0 %548 }
 0xad6   :  { %v551_v60 = vmul.f32 %v1213_v48, %v549_v59 }
 0xad8   :  { %553 = vrot.lane.b32.xlu1 %v551_v60, %s1247_s22 }
 0xadc   :  { %118 = vperm.xlu1 %1191, %v101_v61  }
 0xae6   :  { %v63_v63 = vpop.permute.xlu0 %62 }
 0xae7   :  { %vm77_vm5 = vcmp.eq.s32.totalorder %v63_v63, 1 }
 0xae8   :  { %v93_v2 = vsel %vm77_vm5, %v1301_v16, %v1303_v17 }
 0xb4a   :  { %v554_v62 = vpop.permute.xlu1 %553 }
 0xb4b   :  { %1125 = vmatmul.mubr.msk.f32.vlgmr.msra.gmra.mrb[4].mxu0 %vm149_vm7, %v554_v62 }
 0xb4c   :  { %1175 = vmatpush3.bf16.msra.mxu0 %v1275_v5  ;;  %1138 = vmatprep.mubr.msk.f32.mxu0 %vm1241_vm0, %v1242_v3 }
 0xb4d   :  { %1179 = vmatprep.subr.bf16.mxu0 %v1240_v0 }
 0xb5b   :  { %v119_v1 = vpop.permute.xlu1 %118 }
 0xb5c   :  { %vm133_vm6 = vcmp.eq.s32.totalorder %v119_v1, 1 }
 0xb5d   :  { %v145_v4 = vsel %vm133_vm6, %v1307_v19, %v93_v2 }
 0xc1e   :  { %v623_v7 = vpop.f32.mrb[4].mxu0 }
 0xc1f   :  { %v627_v8 = vadd.f32 %v623_v7, %v145_v4  ;;  %v1126_v9 = vpop.f32.mrb[5].mxu0 }
 0xc21   :  { %v1053_v11 = vmul.f32 -1.442695, %v627_v8 }
 0xc23   :  { %1216 = vpow2.f32 %v1053_v11 }
 0xc2d   :  { %v1217_v12 = vpop.eup %1216 }
 0xc2e   :  { %v631_v13 = vadd.f32 1.0, %v1217_v12 }
 0xc30   :  { %1218 = vrcp.f32 %v631_v13 }
 0xc3a   :  { %v1219_v14 = vpop.eup %1218 }
 0xc3b   :  { %v634_v18 = vmul.f32 2.0, %v1219_v14  ;;  %v636_v22 = vmul.f32 %v1219_v14, %v545_v55 }
 0xc3d   :  { %v1054_v0 = vadd.f32 -1.0, %v634_v18 }
 0xc3f   :  { %638 = vrot.lane.b32.xlu0 %v1054_v0, %s1244_s17 }
 0xcb1   :  { %v639_v20 = vpop.permute.xlu0 %638 }
 0xcb2   :  { %v641_v21 = vmul.f32 %v1219_v14, %v639_v20 }
 0xcb4   :  { %643 = vrot.lane.b32.xlu1 %v641_v21, %s1245_s18 }
 0xd26   :  { %v644_v23 = vpop.permute.xlu1 %643 }
 0xd27   :  { %v646_v24 = vadd.f32 %v644_v23, %v636_v22 }
 0xd29   :  { %1220 = vtanh.f32 %v646_v24 }
 0xd33   :  { %v1221_v26 = vpop.eup %1220 }
 0xd34   :  { %649 = vrot.lane.b32.xlu0 %v1221_v26, %s1246_s21 }
 0xd38   :  { %65 = vperm.xlu0 %1190, %v46_v27  }
 0xda6   :  { %v650_v28 = vpop.permute.xlu0 %649 }
 0xda7   :  { %v652_v29 = vmul.f32 %v1219_v14, %v650_v28  ;;  %v18_v14 = vld [vmem:[%s1444_s0 + $0x38] sm:$0xff] }
 0xda8   :  { %vm32_vm1 = vcmp.eq.s32.totalorder %v18_v14, 0 }
 0xda9   :  { %654 = vrot.lane.b32.xlu1 %v652_v29, %s1247_s22  ;;  %v104_v22 = vsel %vm32_vm1, 1, %v1243_v6 }
 0xdad   :  { %121 = vperm.xlu1 %1191, %v102_v30  }
 0xdb7   :  { %v66_v32 = vpop.permute.xlu0 %65 }
 0xdb8   :  { %vm78_vm10 = vcmp.eq.s32.totalorder %v66_v32, 1 }
 0xdb9   :  { %v94_v34 = vsel %vm78_vm10, %v1301_v16, %v1303_v17 }
 0xe1b   :  { %v655_v31 = vpop.permute.xlu1 %654 }
 0xe1c   :  { %1132 = vmatmul.mubr.msk.f32.vlgmr.msra.gmra.mrb[4].mxu1 %vm149_vm7, %v655_v31 }
 0xe1d   :  { %1178 = vmatpush3.bf16.msra.mxu1 %v1275_v5  ;;  %1145 = vmatprep.mubr.msk.f32.mxu1 %vm1241_vm0, %v1242_v3 }
 0xe2c   :  { %v122_v33 = vpop.permute.xlu1 %121 }
 0xe2d   :  { %vm134_vm11 = vcmp.eq.s32.totalorder %v122_v33, 1 }
 0xe2e   :  { %v146_v35 = vsel %vm134_vm11, %v1307_v19, %v94_v34 }
 0xeef   :  { %v724_v36 = vpop.f32.mrb[4].mxu1 }
 0xef0   :  { %v728_v37 = vadd.f32 %v724_v36, %v146_v35  ;;  %v1133_v38 = vpop.f32.mrb[5].mxu1 }
 0xef1   :  { %v22_v38 = vld [vmem:[%s1443_s1 + $0x18] sm:$0xff] }
 0xef2   :  { %v1056_v39 = vmul.f32 -1.442695, %v728_v37 }
 0xef4   :  { %1222 = vpow2.f32 %v1056_v39  ;;  %v23_v39 = vld [vmem:[%s1443_s1 + $0x20] sm:$0xff] }
 0xefe   :  { %v1223_v40 = vpop.eup %1222 }
 0xeff   :  { %v732_v41 = vadd.f32 1.0, %v1223_v40  ;;  %v1180_v40 = vpack.c.bf16 %v23_v39, %v22_v38 }
 0xf01   :  { %1224 = vrcp.f32 %v732_v41 }
 0xf0b   :  { %v1225_v5 = vpop.eup %1224 }
 0xf0c   :  { %v735_v42 = vmul.f32 2.0, %v1225_v5  ;;  %v737_v46 = vmul.f32 %v1225_v5, %v646_v24 }
 0xf0e   :  { %v1057_v43 = vadd.f32 -1.0, %v735_v42 }
 0xf10   :  { %739 = vrot.lane.b32.xlu0 %v1057_v43, %s1244_s17 }
 0xf82   :  { %v740_v44 = vpop.permute.xlu0 %739 }
 0xf83   :  { %v742_v45 = vmul.f32 %v1225_v5, %v740_v44  ;;  %v24_v44 = vld [vmem:[%s1443_s1 + $0x28] sm:$0xff] }
 0xf85   :  { %744 = vrot.lane.b32.xlu1 %v742_v45, %s1245_s18  ;;  %v959_v45 = vrot.slane %v24_v44, %v139_v15 }
 0xff7   :  { %v745_v47 = vpop.permute.xlu1 %744 }
 0xff8   :  { %v747_v48 = vadd.f32 %v745_v47, %v737_v46 }
 0xffa   :  { %1226 = vtanh.f32 %v747_v48 }
0x1004   :  { %v1227_v50 = vpop.eup %1226 }
0x1005   :  { %750 = vrot.lane.b32.xlu0 %v1227_v50, %s1246_s21 }
0x1009   :  { %68 = vperm.xlu0 %1190, %v47_v51  }
0x1077   :  { %v751_v52 = vpop.permute.xlu0 %750 }
0x1078   :  { %v753_v53 = vmul.f32 %v1225_v5, %v751_v52 }
0x107a   :  { %755 = vrot.lane.b32.xlu1 %v753_v53, %s1247_s22 }
0x107e   :  { %124 = vperm.xlu1 %1191, %v103_v54  }
0x1088   :  { %v69_v56 = vpop.permute.xlu0 %68 }
0x1089   :  { %vm79_vm14 = vcmp.eq.s32.totalorder %v69_v56, 1 }
0x108a   :  { %v95_v58 = vsel %vm79_vm14, %v1301_v16, %v1303_v17 }
0x10ec   :  { %v756_v55 = vpop.permute.xlu1 %755 }
0x10ed   :  { %1139 = vmatmul.mubr.msk.f32.vlgmr.msra.gmra.mrb[6].mxu0 %vm149_vm7, %v756_v55 }
0x10ee   :  { %1152 = vmatprep.mubr.msk.f32.mxu0 %vm1241_vm0, %v1242_v3  ;;  %vm40_vm0 = vcmp.eq.s32.totalorder %v18_v14, 1  ;;  %1181 = vmatpush3.bf16.msra.mxu0 %v1180_v40 }
0x10ef   :  { %v48_v0 = vsel %vm40_vm0, 1, %v1243_v6 }
0x10fd   :  { %v125_v57 = vpop.permute.xlu1 %124 }
0x10fe   :  { %vm135_vm15 = vcmp.eq.s32.totalorder %v125_v57, 1 }
0x10ff   :  { %v147_v59 = vsel %vm135_vm15, %v1307_v19, %v95_v58 }
0x11c0   :  { %v825_v60 = vpop.f32.mrb[6].mxu0 }
0x11c1   :  { %v829_v61 = vadd.f32 %v825_v60, %v147_v59  ;;  %v1140_v62 = vpop.f32.mrb[7].mxu0 }
0x11c3   :  { %v1059_v63 = vmul.f32 -1.442695, %v829_v61 }
0x11c5   :  { %1228 = vpow2.f32 %v1059_v63 }
0x11cf   :  { %v1229_v1 = vpop.eup %1228 }
0x11d0   :  { %v833_v2 = vadd.f32 1.0, %v1229_v1 }
0x11d2   :  { %1230 = vrcp.f32 %v833_v2 }
0x11dc   :  { %v1231_v4 = vpop.eup %1230 }
0x11dd   :  { %v836_v7 = vmul.f32 2.0, %v1231_v4  ;;  %v838_v11 = vmul.f32 %v1231_v4, %v747_v48 }
0x11df   :  { %v1060_v3 = vadd.f32 -1.0, %v836_v7 }
0x11e1   :  { %840 = vrot.lane.b32.xlu0 %v1060_v3, %s1244_s17 }
0x1253   :  { %v841_v8 = vpop.permute.xlu0 %840 }
0x1254   :  { %v843_v9 = vmul.f32 %v1231_v4, %v841_v8 }
0x1256   :  { %845 = vrot.lane.b32.xlu1 %v843_v9, %s1245_s18 }
0x12c8   :  { %v846_v12 = vpop.permute.xlu1 %845 }
0x12c9   :  { %v848_v13 = vadd.f32 %v846_v12, %v838_v11 }
0x12cb   :  { %1232 = vtanh.f32 %v848_v13 }
0x12d5   :  { %v1233_v18 = vpop.eup %1232 }
0x12d6   :  { %851 = vrot.lane.b32.xlu0 %v1233_v18, %s1246_s21 }
0x12da   :  { %71 = vperm.xlu0 %1190, %v48_v0  }
0x1348   :  { %v852_v20 = vpop.permute.xlu0 %851 }
0x1349   :  { %v854_v21 = vmul.f32 %v1231_v4, %v852_v20 }
0x134b   :  { %856 = vrot.lane.b32.xlu1 %v854_v21, %s1247_s22 }
0x134f   :  { %127 = vperm.xlu1 %1191, %v104_v22  }
0x1359   :  { %v72_v24 = vpop.permute.xlu0 %71 }
0x135a   :  { %vm80_vm2 = vcmp.eq.s32.totalorder %v72_v24, 1 }
0x135b   :  { %v96_v26 = vsel %vm80_vm2, %v1301_v16, %v1303_v17 }
0x13bd   :  { %v857_v23 = vpop.permute.xlu1 %856 }
0x13be   :  { %1146 = vmatmul.mubr.msk.f32.vlgmr.msra.gmra.mrb[6].mxu1 %vm149_vm7, %v857_v23 }
0x13ce   :  { %v128_v25 = vpop.permute.xlu1 %127 }
0x13cf   :  { %vm136_vm3 = vcmp.eq.s32.totalorder %v128_v25, 1 }
0x13d0   :  { %v148_v27 = vsel %vm136_vm3, %v1307_v19, %v96_v26 }
0x1491   :  { %v926_v28 = vpop.f32.mrb[6].mxu1 }
0x1492   :  { %v930_v29 = vadd.f32 %v926_v28, %v148_v27  ;;  %v1147_v30 = vpop.f32.mrb[7].mxu1 }
0x1494   :  { %v1062_v31 = vmul.f32 -1.442695, %v930_v29 }
0x1496   :  { %1234 = vpow2.f32 %v1062_v31 }
0x14a0   :  { %v1235_v32 = vpop.eup %1234 }
0x14a1   :  { %v934_v6 = vadd.f32 1.0, %v1235_v32 }
0x14a3   :  { %1236 = vrcp.f32 %v934_v6 }
0x14ad   :  { %v1237_v33 = vpop.eup %1236 }
0x14ae   :  { %v937_v34 = vmul.f32 2.0, %v1237_v33  ;;  %v939_v16 = vmul.f32 %v1237_v33, %v848_v13 }
0x14b0   :  { %v1063_v35 = vadd.f32 -1.0, %v937_v34 }
0x14b2   :  { %941 = vrot.lane.b32.xlu0 %v1063_v35, %s1244_s17 }
0x1524   :  { %v942_v36 = vpop.permute.xlu0 %941 }
0x1525   :  { %v944_v37 = vmul.f32 %v1237_v33, %v942_v36 }
0x1527   :  { %946 = vrot.lane.b32.xlu1 %v944_v37, %s1245_s18 }
0x1599   :  { %v947_v17 = vpop.permute.xlu1 %946 }
0x159a   :  { %v949_v19 = vadd.f32 %v947_v17, %v939_v16 }
0x159c   :  { %1238 = vtanh.f32 %v949_v19 }
0x15a6   :  { %v1239_v41 = vpop.eup %1238 }
0x15a7   :  { %952 = vrot.lane.b32.xlu0 %v1239_v41, %s1246_s21 }
0x1619   :  { %v953_v5 = vpop.permute.xlu0 %952 }
0x161a   :  { %v955_v42 = vmul.f32 %v1237_v33, %v953_v5 }
0x161c   :  { %961 = vrot.lane.b32.xlu1 %v955_v42, %s1247_s22 }
0x168e   :  { %v962_v43 = vpop.permute.xlu1 %961 }
0x168f   :  { %1153 = vmatmul.mubr.msk.f32.vlgmr.msra.gmra.mrb[8].mxu0 %vm149_vm7, %v962_v43 }
0x1762   :  { %v1031_v46 = vpop.f32.mrb[8].mxu0 }
0x1763   :  { %v1032_v47 = vadd.f32 %v1031_v46, %v959_v45  ;;  %v1154_v48 = vpop.f32.mrb[9].mxu0 }
0x1765   :  { %1036 = vst.msk [vmem:[%s1445_s2] sm:$0xff] %vm1035_vm4, %v1032_v47 }

</bundles_post_ra>
